<compile_context>
chip_gen: v5e
topology: v5e:2x2
jax: 0.10.0
libtpu: 0.0.40
codegen_flags: <defaults>
</compile_context>

<pallas_src>
import functools

import numpy as np
import jax
import jax.numpy as jnp
from jax.experimental import pallas as pl
from jax.experimental.pallas import tpu as pltpu

N_QUBITS = 4
Q_DEPTH = 6
DIM = 2 ** N_QUBITS          # 16
IN_FEATURES = 768
OUT_FEATURES = 2


# ----------------------- parameter / constant glue -------------------------

def ry_2x2(theta):
    """PennyLane RY(theta) = [[cos t/2, -sin t/2], [sin t/2, cos t/2]] (real)."""
    c = jnp.cos(theta / 2.0)
    s = jnp.sin(theta / 2.0)
    return jnp.stack([jnp.stack([c, -s]), jnp.stack([s, c])]).astype(jnp.float32)


def ry_layer_16(angles):
    """Full-register RY layer: kron over wires, wire 0 outermost (MSB)."""
    m = ry_2x2(angles[0])
    for q in range(1, N_QUBITS):
        m = jnp.kron(m, ry_2x2(angles[q]))
    return m


def cnot_perm_matrix(control, target):
    """Column-vector convention: new = P @ old."""
    p = np.zeros((DIM, DIM), np.float32)
    for i in range(DIM):
        if (i >> (N_QUBITS - 1 - control)) & 1:
            j = i ^ (1 << (N_QUBITS - 1 - target))
        else:
            j = i
        p[i, j] = 1.0
    return p


def _bits_table():
    """bits[q, i] = q-th wire's bit of basis index i (wire 0 = MSB)."""
    return np.array([[(i >> (N_QUBITS - 1 - q)) & 1 for i in range(DIM)]
                     for q in range(N_QUBITS)], np.float32)          # (4, 16)


def build_constants(q_params, w_post):
    """Fold the fixed circuit + readout into two small matrices."""
    # entangling layer = CNOT(0,1), CNOT(2,3), then CNOT(1,2)
    m_cnot = cnot_perm_matrix(1, 2) @ cnot_perm_matrix(2, 3) @ cnot_perm_matrix(0, 1)
    cnot_t = jnp.asarray(m_cnot.T)                                   # row-vector form

    qw = q_params.reshape(Q_DEPTH, N_QUBITS)
    m_circ = jnp.eye(DIM, dtype=jnp.float32)
    for k in range(Q_DEPTH):                                         # state @ cnot_t @ r_t[k], k = 0..5
        m_circ = m_circ @ cnot_t @ ry_layer_16(qw[k]).T              # (16, 16)

    bits = _bits_table()                                             # (4, 16)
    zmat = (1.0 - 2.0 * bits.T).astype(np.float32)                   # (16, 4) PauliZ signs
    zw = jnp.asarray(zmat) @ w_post.T.astype(jnp.float32)            # (16, 2) fused readout
    return m_circ, jnp.asarray(bits), zw


# -------------------------------- kernel -----------------------------------

def dressed_qnet_kernel(x_ref, w_pre_t_ref, b_pre_ref, bits_ref,
                        m_circ_ref, zw_ref, b_post_ref, out_ref):
    # pre_net (bf16 MXU operands, f32 accumulate) + tanh squashing
    pre = jnp.dot(x_ref[...], w_pre_t_ref[...],
                  preferred_element_type=jnp.float32) + b_pre_ref[...]   # (TB, 4) f32
    half = jnp.tanh(pre) * (np.pi / 4.0)          # = (tanh(pre) * pi/2) / 2, folded scale

    # H layer + batch-dependent RY(q_in) layer: the state is a tensor product,
    # so build it with per-wire broadcast multiply-adds (VPU only, no MXU).
    c = jnp.cos(half)
    s = jnp.sin(half)
    a0 = c - s                                    # amplitude for bit = 0 (x sqrt(2))
    d = s + s                                     # (c+s) - (c-s)
    bits = bits_ref[...]                          # (4, 16)
    state = a0[:, 0:1] + d[:, 0:1] * bits[0:1, :]
    for q in range(1, N_QUBITS):
        state = state * (a0[:, q:q + 1] + d[:, q:q + 1] * bits[q:q + 1, :])
    state = state * 0.25                          # (1/sqrt(2))^4 from the Hadamards

    # folded fixed circuit: 6 x (entangler + RY(q_params)) == one 16x16 matmul
    state = jnp.dot(state, m_circ_ref[...], preferred_element_type=jnp.float32)

    # |amp|^2 -> PauliZ expvals -> post_net, folded into one (16,2) matmul
    probs = state * state
    out_ref[...] = jnp.dot(probs, zw_ref[...],
                           preferred_element_type=jnp.float32) + b_post_ref[...]


@functools.partial(jax.jit, static_argnames=("block_b", "use_bf16"))
def dressed_quantum_net(x, w_pre, b_pre, q_params, w_post, b_post,
                        *, block_b=1024, use_bf16=True):
    bsz = x.shape[0]
    m_circ, bits, zw = build_constants(q_params, w_post)

    in_dtype = jnp.bfloat16 if use_bf16 else jnp.float32
    x_c = x.astype(in_dtype)
    w_pre_t = w_pre.T.astype(in_dtype)                    # (768, 4)
    b_pre2 = b_pre.reshape(1, -1).astype(jnp.float32)     # (1, 4)
    b_post2 = b_post.reshape(1, -1).astype(jnp.float32)   # (1, 2)

    # batch tiling: TB rows per grid step (double-buffered x DMA), pad if needed
    tb = bsz if bsz <= block_b else block_b               # block_b is a multiple of 8
    pad = (-bsz) % tb
    if pad:
        x_c = jnp.pad(x_c, ((0, pad), (0, 0)))
    nb = (bsz + pad) // tb

    def const(shape):
        return pl.BlockSpec(shape, lambda i: (0, 0))      # resident across the grid

    out = pl.pallas_call(
        dressed_qnet_kernel,
        out_shape=jax.ShapeDtypeStruct((bsz + pad, OUT_FEATURES), jnp.float32),
        grid=(nb,),
        in_specs=[
            pl.BlockSpec((tb, IN_FEATURES), lambda i: (i, 0)),   # x (streamed)
            const((IN_FEATURES, N_QUBITS)),                      # w_pre.T
            const((1, N_QUBITS)),                                # b_pre
            const((N_QUBITS, DIM)),                              # bit masks
            const((DIM, DIM)),                                   # folded circuit
            const((DIM, OUT_FEATURES)),                          # folded Z @ W_post.T
            const((1, OUT_FEATURES)),                            # b_post
        ],
        out_specs=pl.BlockSpec((tb, OUT_FEATURES), lambda i: (i, 0)),
        compiler_params=pltpu.CompilerParams(
            dimension_semantics=("parallel",)),
    )(x_c, w_pre_t, b_pre2, bits, m_circ, zw, b_post2)
    return out[:bsz] if pad else out


# ---------------------- pure-JAX reference (sanity) -------------------------

def _apply_1q(state, gate, wire):
    s = jnp.tensordot(gate, state, axes=[[1], [wire]])
    return jnp.moveaxis(s, 0, wire)


def _apply_cnot(state, c, t):
    cnot = jnp.array([[1, 0, 0, 0],
                      [0, 1, 0, 0],
                      [0, 0, 0, 1],
                      [0, 0, 1, 0]], jnp.float32).reshape(2, 2, 2, 2)
    s = jnp.tensordot(cnot, state, axes=[[2, 3], [c, t]])
    return jnp.moveaxis(s, [0, 1], [c, t])


def reference_forward(x, w_pre, b_pre, q_params, w_post, b_post):
    """Full-f32, gate-by-gate simulation of the original module."""
    pre = x @ w_pre.T + b_pre
    q_in = jnp.tanh(pre) * (np.pi / 2.0)
    qw = q_params.reshape(Q_DEPTH, N_QUBITS)
    h = jnp.array([[1.0, 1.0], [1.0, -1.0]], jnp.float32) / np.sqrt(2.0)
    bits = _bits_table().T                                           # (16, 4)
    rows = []
    for b in range(x.shape[0]):
        st = jnp.zeros((2,) * N_QUBITS, jnp.float32).at[(0,) * N_QUBITS].set(1.0)
        for w in range(N_QUBITS):
            st = _apply_1q(st, h, w)
        for w in range(N_QUBITS):
            st = _apply_1q(st, ry_2x2(q_in[b, w]), w)
        for k in range(Q_DEPTH):
            st = _apply_cnot(st, 0, 1)
            st = _apply_cnot(st, 2, 3)
            st = _apply_cnot(st, 1, 2)
            for w in range(N_QUBITS):
                st = _apply_1q(st, ry_2x2(qw[k, w]), w)
        probs = (st ** 2).reshape(DIM)
        rows.append(probs @ (1.0 - 2.0 * bits))
    q_out = jnp.stack(rows)
    return q_out @ w_post.T + b_post


# --------------------------------- main -------------------------------------

if __name__ == "__main__":
    key = jax.random.PRNGKey(0)
    k_x, k_wpre, k_bpre, k_q, k_wpost, k_bpost = jax.random.split(key, 6)

    batch = 2
    x = jax.random.normal(k_x, (batch, IN_FEATURES), jnp.float32)

    # deterministic parameter init (shapes match the torch module's __init__)
    w_pre = 0.02 * jax.random.normal(k_wpre, (N_QUBITS, IN_FEATURES), jnp.float32)
    b_pre = 0.02 * jax.random.normal(k_bpre, (N_QUBITS,), jnp.float32)
    q_params = 0.01 * jax.random.normal(k_q, (Q_DEPTH * N_QUBITS,), jnp.float32)
    w_post = 0.1 * jax.random.normal(k_wpost, (OUT_FEATURES, N_QUBITS), jnp.float32)
    b_post = 0.1 * jax.random.normal(k_bpost, (OUT_FEATURES,), jnp.float32)

    out = dressed_quantum_net(x, w_pre, b_pre, q_params, w_post, b_post)
    out = jax.block_until_ready(out)

    ref = reference_forward(x, w_pre, b_pre, q_params, w_post, b_post)
    ref = jax.block_until_ready(ref)
    assert out.shape == (batch, OUT_FEATURES)
    # tolerance accounts for bf16 pre_net inputs (f32 accumulate) in the kernel
    np.testing.assert_allclose(np.asarray(out), np.asarray(ref),
                               rtol=2e-2, atol=2e-3)

    print("KERNEL_OK")
</pallas_src>

<mosaic_0001>
module attributes {stable_mosaic.version = 11 : i64} {
  func.func @dressed_qnet_kernel(%arg0: i32, %arg1: memref<2x768xbf16, #tpu.memory_space<vmem>>, %arg2: memref<768x4xbf16, #tpu.memory_space<vmem>>, %arg3: memref<1x4xf32, #tpu.memory_space<vmem>>, %arg4: memref<4x16xf32, #tpu.memory_space<vmem>>, %arg5: memref<16x16xf32, #tpu.memory_space<vmem>>, %arg6: memref<16x2xf32, #tpu.memory_space<vmem>>, %arg7: memref<1x2xf32, #tpu.memory_space<vmem>>, %arg8: memref<2x2xf32, #tpu.memory_space<vmem>>) attributes {dimension_semantics = [#tpu.dimension_semantics<parallel>], iteration_bounds = array<i64: 1>, scalar_prefetch = 0 : i64, scratch_operands = 0 : i64, tpu.core_type = #tpu.core_type<tc>, window_params = [{transform_indices = @transform_0, window_bounds = array<i64: 2, 768>}, {pipeline_mode = #tpu.pipeline_mode<synchronous>, transform_indices = @transform_1, window_bounds = array<i64: 768, 4>}, {pipeline_mode = #tpu.pipeline_mode<synchronous>, transform_indices = @transform_2, window_bounds = array<i64: 1, 4>}, {pipeline_mode = #tpu.pipeline_mode<synchronous>, transform_indices = @transform_3, window_bounds = array<i64: 4, 16>}, {pipeline_mode = #tpu.pipeline_mode<synchronous>, transform_indices = @transform_4, window_bounds = array<i64: 16, 16>}, {pipeline_mode = #tpu.pipeline_mode<synchronous>, transform_indices = @transform_5, window_bounds = array<i64: 16, 2>}, {pipeline_mode = #tpu.pipeline_mode<synchronous>, transform_indices = @transform_6, window_bounds = array<i64: 1, 2>}, {transform_indices = @transform_7, window_bounds = array<i64: 2, 2>}]} {
    %c0 = arith.constant 0 : index
    %c0_0 = arith.constant 0 : index
    %0 = vector.load %arg1[%c0, %c0_0] : memref<2x768xbf16, #tpu.memory_space<vmem>>, vector<2x768xbf16>
    %c0_1 = arith.constant 0 : index
    %c0_2 = arith.constant 0 : index
    %1 = vector.load %arg2[%c0_1, %c0_2] : memref<768x4xbf16, #tpu.memory_space<vmem>>, vector<768x4xbf16>
    %cst = arith.constant dense<0.000000e+00> : vector<2x4xf32>
    %2 = tpu.matmul %0, %1, %cst {dimension_numbers = #tpu.dot_dimension_numbers<[1], [0], [0], [1], [0, 0, 1, 1], [], []>} : vector<2x768xbf16>, vector<768x4xbf16>, vector<2x4xf32> -> vector<2x4xf32>
    %c0_3 = arith.constant 0 : index
    %c0_4 = arith.constant 0 : index
    %3 = vector.load %arg3[%c0_3, %c0_4] : memref<1x4xf32, #tpu.memory_space<vmem>>, vector<1x4xf32>
    %4 = vector.broadcast %3 : vector<1x4xf32> to vector<2x4xf32>
    %5 = arith.addf %2, %4 : vector<2x4xf32>
    %6 = math.tanh %5 : vector<2x4xf32>
    %cst_5 = arith.constant 0.785398185 : f32
    %7 = vector.broadcast %cst_5 : f32 to vector<2x4xf32>
    %8 = arith.mulf %6, %7 : vector<2x4xf32>
    %9 = math.cos %8 : vector<2x4xf32>
    %10 = math.sin %8 : vector<2x4xf32>
    %11 = arith.subf %9, %10 : vector<2x4xf32>
    %12 = arith.addf %10, %10 : vector<2x4xf32>
    %c0_6 = arith.constant 0 : index
    %c0_7 = arith.constant 0 : index
    %13 = vector.load %arg4[%c0_6, %c0_7] : memref<4x16xf32, #tpu.memory_space<vmem>>, vector<4x16xf32>
    %14 = vector.extract_strided_slice %11 {offsets = [0, 0], sizes = [2, 1], strides = [1, 1]} : vector<2x4xf32> to vector<2x1xf32>
    %15 = vector.extract_strided_slice %12 {offsets = [0, 0], sizes = [2, 1], strides = [1, 1]} : vector<2x4xf32> to vector<2x1xf32>
    %16 = vector.extract_strided_slice %13 {offsets = [0, 0], sizes = [1, 16], strides = [1, 1]} : vector<4x16xf32> to vector<1x16xf32>
    %17 = vector.broadcast %15 : vector<2x1xf32> to vector<2x16xf32>
    %18 = vector.broadcast %16 : vector<1x16xf32> to vector<2x16xf32>
    %19 = arith.mulf %17, %18 : vector<2x16xf32>
    %20 = vector.broadcast %14 : vector<2x1xf32> to vector<2x16xf32>
    %21 = arith.addf %20, %19 : vector<2x16xf32>
    %22 = vector.extract_strided_slice %11 {offsets = [0, 1], sizes = [2, 1], strides = [1, 1]} : vector<2x4xf32> to vector<2x1xf32>
    %23 = vector.extract_strided_slice %12 {offsets = [0, 1], sizes = [2, 1], strides = [1, 1]} : vector<2x4xf32> to vector<2x1xf32>
    %24 = vector.extract_strided_slice %13 {offsets = [1, 0], sizes = [1, 16], strides = [1, 1]} : vector<4x16xf32> to vector<1x16xf32>
    %25 = vector.broadcast %23 : vector<2x1xf32> to vector<2x16xf32>
    %26 = vector.broadcast %24 : vector<1x16xf32> to vector<2x16xf32>
    %27 = arith.mulf %25, %26 : vector<2x16xf32>
    %28 = vector.broadcast %22 : vector<2x1xf32> to vector<2x16xf32>
    %29 = arith.addf %28, %27 : vector<2x16xf32>
    %30 = arith.mulf %21, %29 : vector<2x16xf32>
    %31 = vector.extract_strided_slice %11 {offsets = [0, 2], sizes = [2, 1], strides = [1, 1]} : vector<2x4xf32> to vector<2x1xf32>
    %32 = vector.extract_strided_slice %12 {offsets = [0, 2], sizes = [2, 1], strides = [1, 1]} : vector<2x4xf32> to vector<2x1xf32>
    %33 = vector.extract_strided_slice %13 {offsets = [2, 0], sizes = [1, 16], strides = [1, 1]} : vector<4x16xf32> to vector<1x16xf32>
    %34 = vector.broadcast %32 : vector<2x1xf32> to vector<2x16xf32>
    %35 = vector.broadcast %33 : vector<1x16xf32> to vector<2x16xf32>
    %36 = arith.mulf %34, %35 : vector<2x16xf32>
    %37 = vector.broadcast %31 : vector<2x1xf32> to vector<2x16xf32>
    %38 = arith.addf %37, %36 : vector<2x16xf32>
    %39 = arith.mulf %30, %38 : vector<2x16xf32>
    %40 = vector.extract_strided_slice %11 {offsets = [0, 3], sizes = [2, 1], strides = [1, 1]} : vector<2x4xf32> to vector<2x1xf32>
    %41 = vector.extract_strided_slice %12 {offsets = [0, 3], sizes = [2, 1], strides = [1, 1]} : vector<2x4xf32> to vector<2x1xf32>
    %42 = vector.extract_strided_slice %13 {offsets = [3, 0], sizes = [1, 16], strides = [1, 1]} : vector<4x16xf32> to vector<1x16xf32>
    %43 = vector.broadcast %41 : vector<2x1xf32> to vector<2x16xf32>
    %44 = vector.broadcast %42 : vector<1x16xf32> to vector<2x16xf32>
    %45 = arith.mulf %43, %44 : vector<2x16xf32>
    %46 = vector.broadcast %40 : vector<2x1xf32> to vector<2x16xf32>
    %47 = arith.addf %46, %45 : vector<2x16xf32>
    %48 = arith.mulf %39, %47 : vector<2x16xf32>
    %cst_8 = arith.constant 2.500000e-01 : f32
    %49 = vector.broadcast %cst_8 : f32 to vector<2x16xf32>
    %50 = arith.mulf %48, %49 : vector<2x16xf32>
    %c0_9 = arith.constant 0 : index
    %c0_10 = arith.constant 0 : index
    %51 = vector.load %arg5[%c0_9, %c0_10] : memref<16x16xf32, #tpu.memory_space<vmem>>, vector<16x16xf32>
    %cst_11 = arith.constant dense<0.000000e+00> : vector<2x16xf32>
    %52 = tpu.matmul %50, %51, %cst_11 {dimension_numbers = #tpu.dot_dimension_numbers<[1], [0], [0], [1], [0, 0, 1, 1], [], []>} : vector<2x16xf32>, vector<16x16xf32>, vector<2x16xf32> -> vector<2x16xf32>
    %53 = arith.mulf %52, %52 : vector<2x16xf32>
    %c0_12 = arith.constant 0 : index
    %c0_13 = arith.constant 0 : index
    %54 = vector.load %arg6[%c0_12, %c0_13] : memref<16x2xf32, #tpu.memory_space<vmem>>, vector<16x2xf32>
    %cst_14 = arith.constant dense<0.000000e+00> : vector<2x2xf32>
    %55 = tpu.matmul %53, %54, %cst_14 {dimension_numbers = #tpu.dot_dimension_numbers<[1], [0], [0], [1], [0, 0, 1, 1], [], []>} : vector<2x16xf32>, vector<16x2xf32>, vector<2x2xf32> -> vector<2x2xf32>
    %c0_15 = arith.constant 0 : index
    %c0_16 = arith.constant 0 : index
    %56 = vector.load %arg7[%c0_15, %c0_16] : memref<1x2xf32, #tpu.memory_space<vmem>>, vector<1x2xf32>
    %57 = vector.broadcast %56 : vector<1x2xf32> to vector<2x2xf32>
    %58 = arith.addf %55, %57 : vector<2x2xf32>
    %c0_17 = arith.constant 0 : index
    %c0_18 = arith.constant 0 : index
    %59 = vector.load %arg8[%c0_17, %c0_18] : memref<2x2xf32, #tpu.memory_space<vmem>>, vector<2x2xf32>
    tpu.vector_store %arg8[%c0_17, %c0_18], %58 {strides = array<i32>} : memref<2x2xf32, #tpu.memory_space<vmem>>, vector<2x2xf32>,
    return
  }
  func.func @transform_0(%arg0: i32) -> (i32, i32) {
    %c0_i32 = arith.constant 0 : i32
    %c0_i32_0 = arith.constant 0 : i32
    return %arg0, %c0_i32 : i32, i32
  }
  func.func @transform_1(%arg0: i32) -> (i32, i32) {
    %c0_i32 = arith.constant 0 : i32
    %c0_i32_0 = arith.constant 0 : i32
    %c0_i32_1 = arith.constant 0 : i32
    return %c0_i32, %c0_i32_0 : i32, i32
  }
  func.func @transform_2(%arg0: i32) -> (i32, i32) {
    %c0_i32 = arith.constant 0 : i32
    %c0_i32_0 = arith.constant 0 : i32
    %c0_i32_1 = arith.constant 0 : i32
    return %c0_i32, %c0_i32_0 : i32, i32
  }
  func.func @transform_3(%arg0: i32) -> (i32, i32) {
    %c0_i32 = arith.constant 0 : i32
    %c0_i32_0 = arith.constant 0 : i32
    %c0_i32_1 = arith.constant 0 : i32
    return %c0_i32, %c0_i32_0 : i32, i32
  }
  func.func @transform_4(%arg0: i32) -> (i32, i32) {
    %c0_i32 = arith.constant 0 : i32
    %c0_i32_0 = arith.constant 0 : i32
    %c0_i32_1 = arith.constant 0 : i32
    return %c0_i32, %c0_i32_0 : i32, i32
  }
  func.func @transform_5(%arg0: i32) -> (i32, i32) {
    %c0_i32 = arith.constant 0 : i32
    %c0_i32_0 = arith.constant 0 : i32
    %c0_i32_1 = arith.constant 0 : i32
    return %c0_i32, %c0_i32_0 : i32, i32
  }
  func.func @transform_6(%arg0: i32) -> (i32, i32) {
    %c0_i32 = arith.constant 0 : i32
    %c0_i32_0 = arith.constant 0 : i32
    %c0_i32_1 = arith.constant 0 : i32
    return %c0_i32, %c0_i32_0 : i32, i32
  }
  func.func @transform_7(%arg0: i32) -> (i32, i32) {
    %c0_i32 = arith.constant 0 : i32
    %c0_i32_0 = arith.constant 0 : i32
    return %arg0, %c0_i32 : i32, i32
  }
}

</mosaic_0001>

<bundles_post_ra>
// kernel: dressed_quantum_net.1
= control target key start
LH: loop header
LB: loop body
LE: loop exit
PB: predicated region body
PF: predicated region fallthrough
CT: control target
= control target key end

     0   :  { %s1527_s0 = inlined_call_operand.vmem [shape: bf16[2,768], index: 0, kind: input, shape index: {}]   ;;  %s1528_s1 = inlined_call_operand.vmem [shape: bf16[768,4], index: 1, kind: input, shape index: {}]   ;;  %s1529_s2 = inlined_call_operand.vmem [shape: f32[1,4], index: 2, kind: input, shape index: {}]   ;;  %s1530_s3 = inlined_call_operand.vmem [shape: f32[4,16], index: 3, kind: input, shape index: {}]   ;;  %s1531_s4 = inlined_call_operand.vmem [shape: f32[16,16], index: 4, kind: input, shape index: {}]   ;;  %s1532_s5 = inlined_call_operand.vmem [shape: f32[16,2], index: 5, kind: input, shape index: {}]   ;;  %s1533_s6 = inlined_call_operand.vmem [shape: f32[1,2], index: 6, kind: input, shape index: {}]   ;;  %s1534_s7 = inlined_call_operand.hbm [shape: f32[2,2], index: 7, kind: output, shape index: {}]  }
   0x1   :  { %v1153_v0 = vld [vmem:[%s1528_s1 + $0x38] sm:$0xff]  ;;  %v1152_v2 = vld [vmem:[%s1528_s1 + $0x30] sm:$0xff]  ;;  %v1151_v8 = vld [vmem:[%s1528_s1 + $0x28] sm:$0xff] }
   0x2   :  { %v1161_v1 = vld [vmem:[%s1528_s1 + $0x78] sm:$0xff]  ;;  %430 = vmatpush.bf16.msra.mxu0 %v1153_v0  ;;  %v1160_v3 = vld [vmem:[%s1528_s1 + $0x70] sm:$0xff]  ;;  %v1159_v9 = vld [vmem:[%s1528_s1 + $0x68] sm:$0xff] }
   0x3   :  { %443 = vmatpush.bf16.msra.mxu1 %v1161_v1  ;;  %v1169_v4 = vld [vmem:[%s1528_s1 + $0xb8] sm:$0xff]  ;;  %v1168_v6 = vld [vmem:[%s1528_s1 + $0xb0] sm:$0xff]  ;;  %v1167_v10 = vld [vmem:[%s1528_s1 + $0xa8] sm:$0xff] }
   0x4   :  { %v1177_v5 = vld [vmem:[%s1528_s1 + $0xf8] sm:$0xff]  ;;  %456 = vmatpush.bf16.msra.mxu2 %v1169_v4  ;;  %v1176_v7 = vld [vmem:[%s1528_s1 + $0xf0] sm:$0xff]  ;;  %v1175_v11 = vld [vmem:[%s1528_s1 + $0xe8] sm:$0xff] }
   0x5   :  { %469 = vmatpush.bf16.msra.mxu3 %v1177_v5  ;;  %v1150_v12 = vld [vmem:[%s1528_s1 + $0x20] sm:$0xff]  ;;  %v1149_v16 = vld [vmem:[%s1528_s1 + $0x18] sm:$0xff] }
   0x6   :  { %431 = vmatpush.bf16.msra.mxu0 %v1152_v2  ;;  %v1158_v13 = vld [vmem:[%s1528_s1 + $0x60] sm:$0xff]  ;;  %v1157_v18 = vld [vmem:[%s1528_s1 + $0x58] sm:$0xff] }
   0x7   :  { %444 = vmatpush.bf16.msra.mxu1 %v1160_v3  ;;  %v27_v14 = vld [vmem:[%s1527_s0] sm:$0x3f] }
   0x8   :  { %457 = vmatpush.bf16.msra.mxu2 %v1168_v6  ;;  %v1166_v15 = vld [vmem:[%s1528_s1 + $0xa0] sm:$0xff]  ;;  %129 = vst [vmem:[#allocation1] ss:$9 sm:$0xff] %v27_v14 }
   0x9   :  { %470 = vmatpush.bf16.msra.mxu3 %v1176_v7  ;;  %v1174_v17 = vld [vmem:[%s1528_s1 + $0xe0] sm:$0xff] }
   0xa   :  { %432 = vmatpush.bf16.msra.mxu0 %v1151_v8 }
   0xb   :  { %445 = vmatpush.bf16.msra.mxu1 %v1159_v9 }
   0xc   :  { %458 = vmatpush.bf16.msra.mxu2 %v1167_v10 }
   0xd   :  { %471 = vmatpush.bf16.msra.mxu3 %v1175_v11 }
   0xe   :  { %433 = vmatpush.bf16.msra.mxu0 %v1150_v12 }
   0xf   :  { %446 = vmatpush.bf16.msra.mxu1 %v1158_v13 }
  0x10   :  { %12 = vsyncpa [#allocation3], 0  ;;  %459 = vmatpush.bf16.msra.mxu2 %v1166_v15  ;;  %v1165_v19 = vld [vmem:[%s1528_s1 + $0x98] sm:$0xff]  ;;  %v1148_v21 = vld [vmem:[%s1528_s1 + $0x10] sm:$0xff]  ;;  %v1243_v8 = vmov 2   ;;  %v1244_v9 = vmov 0  }
  0x11   :  { %472 = vmatpush.bf16.msra.mxu3 %v1174_v17  ;;  %v1173_v20 = vld [vmem:[%s1528_s1 + $0xd8] sm:$0xff]  ;;  %v1156_v22 = vld [vmem:[%s1528_s1 + $0x50] sm:$0xff]  ;;  %v1147_v25 = vld [vmem:[%s1528_s1 + $0x8] sm:$0xff]  ;;  %1209 = vset.pattern.permute.xlu2 %v1243_v8  ;;  %s937_s16 = sshll.u32 %s1534_s7, 4  ;;  %s938_s16 = int_to_ptr.hbm [resolvable:$true] %s937_s16 }
  0x12   :  { %434 = vmatpush.bf16.msra.mxu0 %v1149_v16  ;;  %v1164_v23 = vld [vmem:[%s1528_s1 + $0x90] sm:$0xff]  ;;  %v1155_v26 = vld [vmem:[%s1528_s1 + $0x48] sm:$0xff]  ;;  %v1146_v29 = vld [vmem:[%s1528_s1] sm:$0xff]  ;;  %1207 = vset.pattern.permute.xlu1 %v1244_v9 }
  0x13   :  { %447 = vmatpush.bf16.msra.mxu1 %v1157_v18  ;;  %v1172_v24 = vld [vmem:[%s1528_s1 + $0xd0] sm:$0xff]  ;;  %v1163_v27 = vld [vmem:[%s1528_s1 + $0x88] sm:$0xff]  ;;  %v1154_v30 = vld [vmem:[%s1528_s1 + $0x40] sm:$0xff]  ;;  %1205 = vset.pattern.permute.xlu0 %v1244_v9 }
  0x14   :  { %460 = vmatpush.bf16.msra.mxu2 %v1165_v19  ;;  %v1171_v28 = vld [vmem:[%s1528_s1 + $0xc8] sm:$0xff]  ;;  %v1185_v31 = vld [vmem:[%s1528_s1 + $0x138] sm:$0xff]  ;;  %v1162_v33 = vld [vmem:[%s1528_s1 + $0x80] sm:$0xff] }
  0x15   :  { %473 = vmatpush.bf16.msra.mxu3 %v1173_v20  ;;  %v1193_v32 = vld [vmem:[%s1528_s1 + $0x178] sm:$0xff]  ;;  %v130_v34 = vld [vmem:[#allocation1] sm:$0xff]  ;;  %v131_v35 = vld [vmem:[#allocation1 + $0x9] sm:$0xff] }
  0x16   :  { %435 = vmatpush.bf16.msra.mxu0 %v1148_v21  ;;  %v1170_v36 = vld [vmem:[%s1528_s1 + $0xc0] sm:$0xff]  ;;  %v1184_v37 = vld [vmem:[%s1528_s1 + $0x130] sm:$0xff]  ;;  %v1183_v41 = vld [vmem:[%s1528_s1 + $0x128] sm:$0xff] }
  0x17   :  { %448 = vmatpush.bf16.msra.mxu1 %v1156_v22  ;;  %v1192_v38 = vld [vmem:[%s1528_s1 + $0x170] sm:$0xff]  ;;  %v133_v40 = vld [vmem:[#allocation1 + $0x1b] sm:$0xff]  ;;  %v1191_v42 = vld [vmem:[%s1528_s1 + $0x168] sm:$0xff] }
  0x18   :  { %461 = vmatpush.bf16.msra.mxu2 %v1164_v23  ;;  %v132_v39 = vld [vmem:[#allocation1 + $0x12] sm:$0xff]  ;;  %v1182_v43 = vld [vmem:[%s1528_s1 + $0x120] sm:$0xff]  ;;  %v1179_v49 = vld [vmem:[%s1528_s1 + $0x108] sm:$0xff] }
  0x19   :  { %474 = vmatpush.bf16.msra.mxu3 %v1172_v24  ;;  %v1190_v44 = vld [vmem:[%s1528_s1 + $0x160] sm:$0xff]  ;;  %v1181_v45 = vld [vmem:[%s1528_s1 + $0x118] sm:$0xff]  ;;  %v1180_v47 = vld [vmem:[%s1528_s1 + $0x110] sm:$0xff] }
  0x1a   :  { %436 = vmatpush.bf16.msra.mxu0 %v1147_v25  ;;  %v1189_v46 = vld [vmem:[%s1528_s1 + $0x158] sm:$0xff]  ;;  %v1188_v48 = vld [vmem:[%s1528_s1 + $0x150] sm:$0xff]  ;;  %v1187_v50 = vld [vmem:[%s1528_s1 + $0x148] sm:$0xff]  ;;  %v1245_v25 = vmov 683565275  }
  0x1b   :  { %449 = vmatpush.bf16.msra.mxu1 %v1155_v26  ;;  %v1178_v51 = vld [vmem:[%s1528_s1 + $0x100] sm:$0xff]  ;;  %v135_v54 = vld [vmem:[#allocation1 + $0x2d] sm:$0xff] }
  0x1c   :  { %462 = vmatpush.bf16.msra.mxu2 %v1163_v27  ;;  %v1186_v52 = vld [vmem:[%s1528_s1 + $0x140] sm:$0xff]  ;;  %v1246_v27 = vmov 2475754826  }
  0x1d   :  { %475 = vmatpush.bf16.msra.mxu3 %v1171_v28  ;;  %v134_v53 = vld [vmem:[#allocation1 + $0x24] sm:$0xff]  ;;  %v1213_v61 = vld [vmem:[%s1529_s2] ss:$0 sm:$0xff] }
  0x1e   :  { %437 = vmatpush.bf16.msra.mxu0 %v1146_v29 }
  0x1f   :  { %450 = vmatpush.bf16.msra.mxu1 %v1154_v30  ;;  %v1247_v30 = vmov 2131351028  }
  0x20   :  { %463 = vmatpush.bf16.msra.mxu2 %v1162_v33  ;;  %v1248_v33 = vmov 2102212464  }
  0x21   :  { %438 = vmatmul.bf16.vlgmr.msra.gmra.mxu0 %v130_v34  ;;  %476 = vmatpush.bf16.msra.mxu3 %v1170_v36  ;;  %v1249_v36 = vmov 920167782  }
  0x22   :  { %482 = vmatpush.bf16.msrb.mxu0 %v1185_v31  ;;  %451 = vmatmul.bf16.vlgmr.msra.gmra.mxu1 %v131_v35 }
  0x23   :  { %495 = vmatpush.bf16.msrb.mxu1 %v1193_v32  ;;  %464 = vmatmul.bf16.vlgmr.msra.gmra.mxu2 %v132_v39  ;;  %v1250_v39 = vmov 1326507024  }
  0x24   :  { %477 = vmatmul.bf16.vlgmr.msra.gmra.mxu3 %v133_v40 }
  0x26   :  { %483 = vmatpush.bf16.msrb.mxu0 %v1184_v37 }
  0x27   :  { %496 = vmatpush.bf16.msrb.mxu1 %v1192_v38 }
  0x2a   :  { %484 = vmatpush.bf16.msrb.mxu0 %v1183_v41 }
  0x2b   :  { %497 = vmatpush.bf16.msrb.mxu1 %v1191_v42 }
  0x2e   :  { %485 = vmatpush.bf16.msrb.mxu0 %v1182_v43 }
  0x2f   :  { %498 = vmatpush.bf16.msrb.mxu1 %v1190_v44 }
  0x32   :  { %486 = vmatpush.bf16.msrb.mxu0 %v1181_v45 }
  0x33   :  { %499 = vmatpush.bf16.msrb.mxu1 %v1189_v46 }
  0x36   :  { %487 = vmatpush.bf16.msrb.mxu0 %v1180_v47 }
  0x37   :  { %500 = vmatpush.bf16.msrb.mxu1 %v1188_v48 }
  0x3a   :  { %488 = vmatpush.bf16.msrb.mxu0 %v1179_v49 }
  0x3b   :  { %501 = vmatpush.bf16.msrb.mxu1 %v1187_v50 }
  0x3e   :  { %489 = vmatpush.bf16.msrb.mxu0 %v1178_v51 }
  0x3f   :  { %502 = vmatpush.bf16.msrb.mxu1 %v1186_v52 }
  0x41   :  { %490 = vmatmul.bf16.vlgmr.msrb.gmra.mxu0 %v134_v53 }
  0x42   :  { %503 = vmatmul.bf16.vlgmr.msrb.gmra.mxu1 %v135_v54 }
  0x9e   :  { %v439_v55 = vpop.f32.mrf.mxu0 }
  0x9f   :  { %v452_v56 = vpop.f32.mrf.mxu1  ;;  %v440_v62 = vadd.f32 %v1213_v61, %v439_v55 }
  0xa1   :  { %v453_v1 = vadd.f32 %v452_v56, %v440_v62 }
  0xa6   :  { %v441_v57 = vpop.f32.mrf.mxu0  ;;  %v465_v59 = vpop.f32.mrf.mxu2 }
  0xa7   :  { %v454_v58 = vpop.f32.mrf.mxu1  ;;  %v478_v60 = vpop.f32.mrf.mxu3  ;;  %v466_v2 = vadd.f32 %v465_v59, %v453_v1 }
  0xa9   :  { %v479_v3 = vadd.f32 %v478_v60, %v466_v2 }
  0xae   :  { %v467_v63 = vpop.f32.mrf.mxu2 }
  0xaf   :  { %v480_v0 = vpop.f32.mrf.mxu3 }
  0xbe   :  { %v491_v4 = vpop.f32.mrf.mxu0 }
  0xbf   :  { %v504_v5 = vpop.f32.mrf.mxu1  ;;  %v492_v6 = vadd.f32 %v491_v4, %v479_v3 }
  0xc1   :  { %v505_v7 = vadd.f32 %v504_v5, %v492_v6 }
  0xc3   :  { %1215 = vtanh.f32 %v505_v7 }
  0xc6   :  { %v493_v10 = vpop.f32.mrf.mxu0 }
  0xc7   :  { %v506_v11 = vpop.f32.mrf.mxu1 }
  0xc9   :  { %v1216_v12 = vpop.eup %1215 }
  0xca   :  { %v1446_v13 = vmul.f32 0.7853982, %v1216_v12 }
  0xcc   :  { %v513_v14 = vand.u32 2139095040, %v1446_v13  ;;  %v510_v17 = vand.u32 2147483647, %v1446_v13  ;;  %vm512_vm12 = vcmp.lt.s32.totalorder %v1446_v13, 0 }
  0xce   :  { %v514_v15 = vshrl.u32 %v513_v14, 23  ;;  %v517_v19 = vand.u32 8388607, %v510_v17  ;;  %vm511_vm13 = vcmp.le.f32.partialorder %v510_v17, 0.7853982 }
  0xd0   :  { %v1138_v16 = vadd.s32 4294967169, %v514_v15  ;;  %v518_v23 = vor.u32 8388608, %v517_v19 }
  0xd2   :  { %v520_v18 = vadd.s32 1, %v1138_v16  ;;  %v1463_v44 = vshll.u32 %v518_v23, 8 }
  0xd4   :  { %vm521_vm0 = vcmp.gt.s32.totalorder %v520_v18, 0  ;;  %v559_v53 = vand.u32 65535, %v1463_v44  ;;  %v560_v54 = vshrl.u32 %v1463_v44, 16 }
  0xd5   :  { %v522_v20 = vsel %vm521_vm0, %v520_v18, 0 }
  0xd6   :  { %v524_v21 = vand.u32 31, %v522_v20  ;;  %v1454_v24 = vshrl.u32 %v522_v20, 5 }
  0xd8   :  { %v1452_v22 = vsub.s32 32, %v524_v21  ;;  %v527_v26 = vshll.u32 %v1245_v25, %v524_v21  ;;  %v530_v28 = vshll.u32 %v1246_v27, %v524_v21  ;;  %v533_v32 = vshll.u32 %v1247_v30, %v524_v21 }
  0xd9   :  { %v536_v35 = vshll.u32 %v1248_v33, %v524_v21  ;;  %v539_v38 = vshll.u32 %v1249_v36, %v524_v21  ;;  %vm542_vm1 = vcmp.lt.s32.totalorder %v1454_v24, 1  ;;  %vm545_vm2 = vcmp.lt.s32.totalorder %v1454_v24, 4 }
  0xda   :  { %v528_v29 = vshrl.u32 %v1246_v27, %v1452_v22  ;;  %v531_v31 = vshrl.u32 %v1247_v30, %v1452_v22  ;;  %v534_v34 = vshrl.u32 %v1248_v33, %v1452_v22  ;;  %v537_v37 = vshrl.u32 %v1249_v36, %v1452_v22 }
  0xdb   :  { %v540_v40 = vshrl.u32 %v1250_v39, %v1452_v22  ;;  %vm544_vm3 = vcmp.lt.s32.totalorder %v1454_v24, 3  ;;  %vm543_vm4 = vcmp.lt.s32.totalorder %v1454_v24, 2  ;;  %v526_v20 = vshrl.u32 %v1245_v25, %v1452_v22 }
  0xdc   :  { %v529_v41 = vor.u32 %v528_v29, %v527_v26  ;;  %v532_v42 = vor.u32 %v531_v31, %v530_v28  ;;  %v535_v43 = vor.u32 %v534_v34, %v533_v32  ;;  %v538_v45 = vor.u32 %v537_v37, %v536_v35 }
  0xdd   :  { %v541_v46 = vor.u32 %v540_v40, %v539_v38 }
  0xde   :  { %v550_v47 = vsel %vm542_vm1, %v529_v41, %v532_v42  ;;  %v554_v48 = vsel %vm542_vm1, %v532_v42, %v535_v43  ;;  %v551_v49 = vsel %vm545_vm2, %v538_v45, 920167782  ;;  %v547_v16 = vsel %vm545_vm2, %v535_v43, 2102212464 }
  0xdf   :  { %v555_v50 = vsel %vm545_vm2, %v541_v46, 1326507024  ;;  %v552_v51 = vsel %vm544_vm3, %v535_v43, %v551_v49  ;;  %v546_v29 = vsel %vm542_vm1, %v526_v20, %v529_v41  ;;  %v548_v30 = vsel %vm544_vm3, %v532_v42, %v547_v16 }
  0xe0   :  { %v556_v52 = vsel %vm544_vm3, %v538_v45, %v555_v50  ;;  %v553_v55 = vsel %vm543_vm4, %v550_v47, %v552_v51  ;;  %v549_v22 = vsel %vm543_vm4, %v546_v29, %v548_v30 }
  0xe1   :  { %v557_v56 = vsel %vm543_vm4, %v554_v48, %v556_v52  ;;  %v583_v59 = vand.u32 65535, %v553_v55  ;;  %v584_v60 = vshrl.u32 %v553_v55, 16  ;;  %v603_v37 = vmul.u32 %v1463_v44, %v549_v22 }
  0xe2   :  { %v561_v57 = vand.u32 65535, %v557_v56  ;;  %v562_v58 = vshrl.u32 %v557_v56, 16  ;;  %vm653_vm4 = vweird.f32 %v1446_v13  ;;  %v1252_v22 = vmov 3  }
  0xe3   :  { %v586_v63 = vmul.u32 %v584_v60, %v559_v53  ;;  %v587_v0 = vmul.u32 %v583_v59, %v560_v54  ;;  %v585_v4 = vmul.u32 %v583_v59, %v559_v53  ;;  %v588_v8 = vmul.u32 %v584_v60, %v560_v54 }
  0xe4   :  { %v564_v61 = vmul.u32 %v562_v58, %v559_v53  ;;  %v565_v62 = vmul.u32 %v561_v57, %v560_v54  ;;  %v563_v1 = vmul.u32 %v561_v57, %v559_v53  ;;  %v566_v3 = vmul.u32 %v562_v58, %v560_v54 }
  0xe5   :  { %v589_v5 = vshll.u32 %v586_v63, 16  ;;  %v591_v11 = vshll.u32 %v587_v0, 16  ;;  %v590_v27 = vshrl.u32 %v586_v63, 16  ;;  %v592_v33 = vshrl.u32 %v587_v0, 16 }
  0xe6   :  { %v567_v2 = vshll.u32 %v564_v61, 16  ;;  %v569_v6 = vshll.u32 %v565_v62, 16  ;;  %v568_v21 = vshrl.u32 %v564_v61, 16  ;;  %v570_v31 = vshrl.u32 %v565_v62, 16 }
  0xe7   :  { %vm593_vm6 = vc.u32 %v585_v4, %v589_v5  ;;  %v595_v12 = vadd.s32 %v589_v5, %v585_v4 }
  0xe8   :  { %vm571_vm5 = vc.u32 %v563_v1, %v567_v2  ;;  %v573_v7 = vadd.s32 %v567_v2, %v563_v1  ;;  %v594_v15 = vsel %vm593_vm6, 1, %v1244_v9  ;;  %vm928_vm6 = vcmask 9216  }
  0xe9   :  { %v572_v10 = vsel %vm571_vm5, 1, %v1244_v9  ;;  %v596_v19 = vadd.s32 %v594_v15, %v588_v8  ;;  %vm597_vm8 = vc.u32 %v595_v12, %v591_v11  ;;  %v599_v36 = vadd.s32 %v595_v12, %v591_v11 }
  0xea   :  { %v574_v14 = vadd.s32 %v572_v10, %v566_v3  ;;  %vm575_vm7 = vc.u32 %v573_v7, %v569_v6  ;;  %v598_v26 = vsel %vm597_vm8, 1, %v1244_v9  ;;  %vm874_vm5 = vcmask 130048  }
  0xeb   :  { %v576_v18 = vsel %vm575_vm7, 1, %v1244_v9  ;;  %v600_v28 = vadd.s32 %v598_v26, %v596_v19 }
  0xec   :  { %v578_v23 = vadd.s32 %v576_v18, %v574_v14 }
  0xed   :  { %v601_v34 = vadd.s32 %v600_v28, %v590_v27 }
  0xee   :  { %v579_v32 = vadd.s32 %v578_v23, %v568_v21 }
  0xef   :  { %v602_v25 = vadd.s32 %v601_v34, %v592_v33 }
  0xf0   :  { %v580_v35 = vadd.s32 %v579_v32, %v570_v31 }
  0xf1   :  { %v606_v9 = vadd.s32 1, %v602_v25 }
  0xf2   :  { %vm605_vm9 = vc.u32 %v580_v35, %v599_v36  ;;  %v604_v24 = vadd.s32 %v599_v36, %v580_v35  ;;  %v1251_v36 = vmov 1  }
  0xf3   :  { %v607_v38 = vsel %vm605_vm9, %v606_v9, %v602_v25  ;;  %v872_v25 = vld [vmem:[%s1531_s4] sm:$0xff]  ;;  %v900_v9 = vld [vmem:[%s1532_s5 + $0x8] sm:$0xff] }
  0xf4   :  { %v608_v39 = vadd.s32 %v607_v38, %v603_v37  ;;  %v899_v37 = vld [vmem:[%s1532_s5] sm:$0xff]  ;;  %922 = vmatpush.msrb.mxu3 %v900_v9  ;;  %s1253_s5 = smov [#allocation2]  }
  0xf5   :  { %s935_s14 = sshll.u32 %s1253_s5, 4  ;;  %s936_s14 = int_to_ptr.vmem [resolvable:$true] %s935_s14 }
  0xf6   :  { %v609_v40 = vadd.s32 536870912, %v608_v39  ;;  %923 = vmatpush.msrb.mxu3 %v899_v37 }
  0xf8   :  { %v610_v41 = vshrl.u32 %v609_v40, 30 }
  0xfa   :  { %v611_v43 = vshll.u32 %v610_v41, 30  ;;  %v634_v62 = vsub.s32 4, %v610_v41 }
  0xfc   :  { %v612_v42 = vsub.s32 %v608_v39, %v611_v43  ;;  %v635_v3 = vsel %vm512_vm12, %v634_v62, %v610_v41  ;;  %v821_v41 = vld [vmem:[%s1530_s3] sm:$0xf] }
  0xfd   :  { %v637_v6 = vsel %vm511_vm13, 0, %v635_v3  ;;  %v839_v43 = vperm.slane %v821_v41, 1 }
  0xfe   :  { %vm613_vm10 = vcmp.lt.s32.totalorder %v612_v42, 0  ;;  %v614_v45 = vsub.s32 0, %v612_v42  ;;  %v808_v12 = vadd.s32 3, %v637_v6  ;;  %v654_v18 = vand.u32 3, %v637_v6 }
 0x100   :  { %v615_v46 = vsel %vm613_vm10, %v614_v45, %v612_v42  ;;  %v809_v19 = vand.u32 3, %v808_v12  ;;  %vm655_vm14 = vcmp.lt.s32.totalorder %v654_v18, 2  ;;  %vm656_vm15 = vcmp.eq.s32.totalorder %v654_v18, 0 }
 0x101   :  { %v616_v47 = vclz %v615_v46  ;;  %vm659_vm3 = vcmp.eq.s32.totalorder %v654_v18, 2 }
 0x102   :  { %vm810_vm0 = vcmp.lt.s32.totalorder %v809_v19, 2  ;;  %vm811_vm1 = vcmp.eq.s32.totalorder %v809_v19, 0  ;;  %vm814_vm2 = vcmp.eq.s32.totalorder %v809_v19, 2 }
 0x103   :  { %v1139_v48 = vadd.s32 4294967294, %v616_v47 }
 0x105   :  { %vm1140_vm11 = vcmp.lt.s32.totalorder %v1139_v48, 0 }
 0x106   :  { %v619_v49 = vsel %vm1140_vm11, 0, %v1139_v48 }
 0x107   :  { %v620_v50 = vsub.s32 32, %v619_v49  ;;  %v624_v51 = vsub.s32 4294967266, %v619_v49  ;;  %v621_v52 = vshll.u32 %v612_v42, %v619_v49  ;;  %v827_v42 = vperm.slane %v821_v41, 0 }
 0x109   :  { %v622_v53 = vshrl.u32 %v604_v24, %v620_v50  ;;  %v625_v54 = vadd.s32 127, %v624_v51  ;;  %v851_v24 = vperm.slane %v821_v41, 2 }
 0x10b   :  { %v623_v44 = vor.u32 %v622_v53, %v621_v52  ;;  %v626_v55 = vshll.u32 %v625_v54, 23  ;;  %v863_v52 = vperm.slane %v821_v41, 3 }
 0x10d   :  { %v627_v56 = vor.u32 4788187, %v626_v55  ;;  %v630_v58 = vcvt.s32.f32 %v623_v44 }
 0x10f   :  { %v628_v57 = vand.u32 2147483647, %v627_v56 }
 0x111   :  { %v631_v59 = vmul.f32 %v630_v58, %v628_v57 }
 0x113   :  { %v632_v60 = vxor.u32 2147483648, %v631_v59 }
 0x115   :  { %v633_v61 = vsel %vm512_vm12, %v632_v60, %v631_v59 }
 0x116   :  { %v636_v63 = vsel %vm511_vm13, %v1446_v13, %v633_v61  ;;  %v873_v13 = vld [vmem:[%s1531_s4 + $0x8] sm:$0xff] }
 0x117   :  { %v638_v0 = vmul.f32 %v636_v63, %v636_v63  ;;  %892 = vmatpush.msrb.mxu2 %v873_v13 }
 0x119   :  { %v639_v1 = vmul.f32 -0.001358992, %v638_v0  ;;  %v646_v2 = vmul.f32 -0.00019511016, %v638_v0  ;;  %893 = vmatpush.msrb.mxu2 %v872_v25 }
 0x11b   :  { %v640_v4 = vadd.f32 0.041655596, %v639_v1  ;;  %v647_v5 = vadd.f32 0.008332121, %v646_v2 }
 0x11d   :  { %v641_v7 = vmul.f32 %v640_v4, %v638_v0  ;;  %v648_v8 = vmul.f32 %v647_v5, %v638_v0 }
 0x11f   :  { %v642_v10 = vadd.f32 -0.4999988, %v641_v7  ;;  %v649_v11 = vadd.f32 -0.16666654, %v648_v8 }
 0x121   :  { %v643_v14 = vmul.f32 %v642_v10, %v638_v0  ;;  %v650_v15 = vmul.f32 %v649_v11, %v638_v0  ;;  %v1214_v0 = vld [vmem:[%s1533_s6] ss:$0 sm:$0xff] }
 0x123   :  { %v644_v16 = vadd.f32 1.0, %v643_v14  ;;  %v651_v17 = vadd.f32 1.0, %v650_v15 }
 0x125   :  { %v652_v20 = vmul.f32 %v651_v17, %v636_v63  ;;  %v660_v21 = vxor.u32 2147483648, %v644_v16 }
 0x127   :  { %v657_v23 = vxor.u32 2147483648, %v652_v20  ;;  %v816_v27 = vsel %vm814_vm2, %v660_v21, %v652_v20  ;;  %v661_v29 = vsel %vm659_vm3, %v660_v21, %v652_v20 }
 0x129   :  { %v813_v26 = vsel %vm811_vm1, %v644_v16, %v657_v23  ;;  %v658_v28 = vsel %vm656_vm15, %v644_v16, %v657_v23 }
 0x12a   :  { %v817_v30 = vsel %vm810_vm0, %v813_v26, %v816_v27  ;;  %v662_v31 = vsel %vm655_vm14, %v658_v28, %v661_v29 }
 0x12b   :  { %v818_v32 = vsel %vm653_vm4, nan, %v817_v30  ;;  %v663_v33 = vsel %vm653_vm4, nan, %v662_v31 }
 0x12c   :  { %v820_v34 = vadd.f32 %v818_v32, %v818_v32  ;;  %v819_v35 = vsub.f32 %v663_v33, %v818_v32 }
 0x12e   :  { %848 = vperm.xlu2 %1209, %v820_v34   ;;  %824 = vperm.xlu0 %1205, %v820_v34  }
 0x12f   :  { %831 = vperm.xlu1 %1207, %v819_v35  }
 0x136   :  { %1206 = vset.pattern.permute.xlu0 %v1251_v36  ;;  %854 = vperm.xlu2 %1209, %v819_v35  }
 0x137   :  { %1208 = vset.pattern.permute.xlu1 %v1251_v36  ;;  %836 = vperm.xlu0 %1206, %v820_v34  }
 0x138   :  { %842 = vperm.xlu1 %1208, %v819_v35  }
 0x13e   :  { %1211 = vset.pattern.permute.xlu2 %v1252_v22 }
 0x13f   :  { %866 = vperm.xlu2 %1211, %v819_v35   ;;  %1212 = vset.pattern.permute.xlu0 %v1252_v22 }
 0x140   :  { %1210 = vset.pattern.permute.xlu1 %v1252_v22 }
 0x141   :  { %860 = vperm.xlu1 %1210, %v820_v34  }
 0x188   :  { %v849_v39 = vpop.permute.xlu2 %848 }
 0x189   :  { %v852_v53 = vmul.f32 %v851_v24, %v849_v39 }
 0x190   :  { %v855_v48 = vpop.permute.xlu2 %854 }
 0x191   :  { %v857_v55 = vadd.f32 %v855_v48, %v852_v53 }
 0x199   :  { %v867_v57 = vpop.permute.xlu2 %866 }
 0x1a0   :  { %v825_v38 = vpop.permute.xlu0 %824 }
 0x1a1   :  { %v832_v40 = vpop.permute.xlu1 %831  ;;  %v828_v49 = vmul.f32 %v827_v42, %v825_v38 }
 0x1a3   :  { %v834_v51 = vadd.f32 %v832_v40, %v828_v49 }
 0x1a9   :  { %v837_v45 = vpop.permute.xlu0 %836 }
 0x1aa   :  { %v840_v46 = vmul.f32 %v839_v43, %v837_v45  ;;  %v843_v47 = vpop.permute.xlu1 %842 }
 0x1ac   :  { %v845_v50 = vadd.f32 %v843_v47, %v840_v46 }
 0x1ae   :  { %v846_v54 = vmul.f32 %v845_v50, %v834_v51 }
 0x1b0   :  { %v858_v58 = vmul.f32 %v857_v55, %v846_v54 }
 0x1b3   :  { %v861_v44 = vpop.permute.xlu1 %860 }
 0x1b4   :  { %v864_v56 = vmul.f32 %v863_v52, %v861_v44 }
 0x1b6   :  { %v869_v59 = vadd.f32 %v867_v57, %v864_v56 }
 0x1b8   :  { %v870_v60 = vmul.f32 %v869_v59, %v858_v58 }
 0x1ba   :  { %v871_v61 = vmul.f32 0.25, %v870_v60 }
 0x1bc   :  { %1144 = vmatmul.msk.f32.vlgmr.msrb.gmra.mxu2 %vm874_vm5, %v871_v61 }
 0x23f   :  { %v895_v62 = vpop.f32.mrf.mxu2 }
 0x240   :  { %v898_v63 = vmul.f32 %v895_v62, %v895_v62 }
 0x242   :  { %1145 = vmatmul.msk.f32.vlgmr.msrb.gmra.mxu3 %vm874_vm5, %v898_v63 }
 0x2c5   :  { %v925_v1 = vpop.f32.mrf.mxu3 }
 0x2c6   :  { %v926_v2 = vadd.f32 %v1214_v0, %v925_v1 }
 0x2c8   :  { %929 = vst.msk [vmem:[#allocation2] sm:$0x3] %vm928_vm6, %v926_v2 }
 0x2c9   :  { %940 = dma.vmem_to_hbm [thread:$0]  %s936_s14, 32, %s938_s16, [#allocation3]  }
 0x2ca   :  { %1241 = dma.done.wait [#allocation3], 32  }
 0x2cb   :  { %1242 = vsyncadd [#allocation3], 4294967264 }
 0x2cc   :  { %945 = vsyncpa [#allocation3], 1 }

</bundles_post_ra>
